<compile_context>
chip_gen: v7x
topology: tpu7x:2x2x1
jax: 0.10.0
libtpu: 0.0.40
codegen_flags: <defaults>
</compile_context>

<pallas_src>
import jax
import jax.numpy as jnp
from jax.experimental import pallas as pl
from jax.experimental.pallas import tpu as pltpu


# MXU operand / conv-output dtype (accumulation is always f32).
MATMUL_DTYPE = jnp.bfloat16

_VMEM_LIMIT = 32 * 1024 * 1024  # fits every TPU generation incl. v7x (64 MiB)


def _round_up(x, m):
    return (x + m - 1) // m * m


def _pick_tile(mp, cap):
    """Pick a lane tile (multiple of 128) and padded column count.

    Prefers tiles large enough to amortize the ~0.35us per-grid-step overhead
    while keeping >= 2 tiles when possible so the "parallel" grid axis shards
    across both TensorCores on v7x.
    """
    mp128 = _round_up(mp, 128)
    if mp128 <= 128:
        return 128, 128
    half = (mp128 // 2) // 128 * 128
    tile = max(128, min(cap, half))
    return tile, _round_up(mp, tile)


# ---------------------------------------------------------------------------
# Pallas kernels
# ---------------------------------------------------------------------------

def _conv_relu_pool_kernel(p_ref, w_ref, b_ref, o_ref):
    """Fused conv-as-GEMM + bias + ReLU + 2x2 maxpool (one wide GEMM).

    p_ref: (K, 4*Tp)  bf16  patch columns; lane range [q*Tp, (q+1)*Tp) holds
                            pool position q for this tile's pooled pixels
    w_ref: (OC, K)    bf16  conv weights, rows (c, kh, kw)-flattened
    b_ref: (OC, 1)    f32
    o_ref: (OC, Tp)   bf16  lane-dense pooled output tile
    """
    tp = o_ref.shape[-1]
    r = jnp.dot(w_ref[...], p_ref[...], preferred_element_type=jnp.float32)
    # maxpool = max over the 4 lane-aligned q-slabs; bias+ReLU commute with it.
    m = jnp.maximum(jnp.maximum(r[:, 0 * tp:1 * tp], r[:, 1 * tp:2 * tp]),
                    jnp.maximum(r[:, 2 * tp:3 * tp], r[:, 3 * tp:4 * tp]))
    o_ref[...] = jnp.maximum(m + b_ref[...], 0.0).astype(o_ref.dtype)


def conv_relu_pool(patches, w_mat, bias, *, tile_cols):
    """patches: (K, n_tiles*4*Tp), w_mat: (OC, K), bias: (OC, 1) -> (OC, n_tiles*Tp)."""
    k, total = patches.shape
    oc = w_mat.shape[0]
    n_tiles = total // (4 * tile_cols)
    return pl.pallas_call(
        _conv_relu_pool_kernel,
        out_shape=jax.ShapeDtypeStruct((oc, n_tiles * tile_cols), MATMUL_DTYPE),
        grid=(n_tiles,),
        in_specs=[
            pl.BlockSpec((k, 4 * tile_cols), lambda t: (0, t)),
            pl.BlockSpec((oc, k), lambda t: (0, 0)),
            pl.BlockSpec((oc, 1), lambda t: (0, 0)),
        ],
        out_specs=pl.BlockSpec((oc, tile_cols), lambda t: (0, t)),
        compiler_params=pltpu.CompilerParams(
            dimension_semantics=("parallel",),   # M-tiles shard across cores
            vmem_limit_bytes=_VMEM_LIMIT),
    )(patches, w_mat, bias)


def _mlp3_kernel(x_ref, w1_ref, b1_ref, w2_ref, b2_ref, w3_ref, b3_ref, o_ref):
    """Fused fc1+ReLU+fc2+ReLU+fc3; all weights live in VMEM."""
    h = jnp.dot(x_ref[...], w1_ref[...], preferred_element_type=jnp.float32)
    h = jnp.maximum(h + b1_ref[...], 0.0)
    h = jnp.dot(h.astype(MATMUL_DTYPE), w2_ref[...],
                preferred_element_type=jnp.float32)
    h = jnp.maximum(h + b2_ref[...], 0.0)
    h = jnp.dot(h.astype(MATMUL_DTYPE), w3_ref[...],
                preferred_element_type=jnp.float32)
    o_ref[...] = h + b3_ref[...]


def mlp3(x, w1, b1, w2, b2, w3, b3):
    # TODO(synk): give this an N-tiled "parallel" grid once batch grows; at
    # batch 2 a single block (no pipelining needed) is optimal.
    n, d0 = x.shape
    d1, d2, d3 = w1.shape[1], w2.shape[1], w3.shape[1]

    def full(shape):
        return pl.BlockSpec(shape, lambda i: (0,) * len(shape))

    return pl.pallas_call(
        _mlp3_kernel,
        out_shape=jax.ShapeDtypeStruct((n, d3), jnp.float32),
        grid=(1,),
        in_specs=[full((n, d0)),
                  full((d0, d1)), full((1, d1)),
                  full((d1, d2)), full((1, d2)),
                  full((d2, d3)), full((1, d3))],
        out_specs=full((n, d3)),
        compiler_params=pltpu.CompilerParams(
            dimension_semantics=("arbitrary",),
            vmem_limit_bytes=_VMEM_LIMIT),
    )(x, w1, b1, w2, b2, w3, b3)


# ---------------------------------------------------------------------------
# Layer glue (small XLA ops; all heavy compute is in the kernels)
# ---------------------------------------------------------------------------

def pool_patches_wide(x_cnhw, kh, kw, *, tile_cap):
    """Tile-interleaved, pool-ordered im2col from a channel-major (C,N,H,W) tensor.

    Returns patches (K, n_tiles * 4 * Tp) in MATMUL_DTYPE where, within tile t,
    lane q*Tp + col holds the conv patch column for pool position q = dy*2+dx
    and pooled pixel m = t*Tp + col (m = n*OH2*OW2 + yh*OW2 + xh); plus the
    valid pooled-column count, pooled (OH2, OW2), and the tile size.
    """
    c, n, h, w = x_cnhw.shape
    oh, ow = h - kh + 1, w - kw + 1
    oh2, ow2 = oh // 2, ow // 2
    k = c * kh * kw
    mp = n * oh2 * ow2

    tile, mp_pad = _pick_tile(mp, tile_cap)
    n_tiles = mp_pad // tile

    slabs = []
    for dy in range(2):
        for dx in range(2):
            # Tap (i, j) of pool position (dy, dx) at pooled pixel (yh, xh)
            # reads x[c, n, 2*yh + dy + i, 2*xh + dx + j]  -> stride-2 slices.
            taps = [x_cnhw[:, :,
                           dy + i: dy + i + 2 * oh2: 2,
                           dx + j: dx + j + 2 * ow2: 2]
                    for i in range(kh) for j in range(kw)]
            s = jnp.stack(taps, axis=1).reshape(k, mp)       # (K, Mp)
            s = jnp.pad(s, ((0, 0), (0, mp_pad - mp)))
            slabs.append(s.reshape(k, n_tiles, tile))
    # (K, n_tiles, 4, Tp) -> (K, n_tiles*4*Tp): each tile's 4 q-slabs are
    # contiguous and 128-aligned on the lane axis.
    p = jnp.stack(slabs, axis=2).reshape(k, n_tiles * 4 * tile)
    return p.astype(MATMUL_DTYPE), mp, (oh2, ow2), tile


# ---------------------------------------------------------------------------
# Parameters and forward pass
# ---------------------------------------------------------------------------

def init_params(key):
    ks = jax.random.split(key, 10)

    def u(k, shape, fan_in):
        bound = 1.0 / jnp.sqrt(jnp.float32(fan_in))
        return jax.random.uniform(k, shape, jnp.float32, -bound, bound)

    return {
        "conv1_w": u(ks[0], (6, 3, 5, 5), 3 * 5 * 5),
        "conv1_b": u(ks[1], (6,), 3 * 5 * 5),
        "conv2_w": u(ks[2], (16, 6, 5, 5), 6 * 5 * 5),
        "conv2_b": u(ks[3], (16,), 6 * 5 * 5),
        "fc1_w": u(ks[4], (120, 400), 400),   # torch Linear layout: (out, in)
        "fc1_b": u(ks[5], (120,), 400),
        "fc2_w": u(ks[6], (84, 120), 120),
        "fc2_b": u(ks[7], (84,), 120),
        "fc3_w": u(ks[8], (10, 84), 84),
        "fc3_b": u(ks[9], (10,), 84),
    }


def prepare_params(params):
    """One-time conversion of torch-layout params to kernel-ready layouts."""
    f32 = jnp.float32
    # Pad conv1's OC 6 -> 8 (zero rows) for full-sublane, unmasked stores.
    c1_w = jnp.pad(params["conv1_w"].reshape(6, -1), ((0, 2), (0, 0)))
    c1_b = jnp.pad(params["conv1_b"], (0, 2))
    return {
        "c1_w": c1_w.astype(MATMUL_DTYPE),                               # (8, 75)
        "c1_b": c1_b.reshape(8, 1).astype(f32),
        "c2_w": params["conv2_w"].reshape(16, -1).astype(MATMUL_DTYPE),  # (16, 150)
        "c2_b": params["conv2_b"].reshape(16, 1).astype(f32),
        "fc1_w": params["fc1_w"].T.astype(MATMUL_DTYPE),                 # (400, 120)
        "fc1_b": params["fc1_b"].reshape(1, -1).astype(f32),
        "fc2_w": params["fc2_w"].T.astype(MATMUL_DTYPE),                 # (120, 84)
        "fc2_b": params["fc2_b"].reshape(1, -1).astype(f32),
        "fc3_w": params["fc3_w"].T.astype(MATMUL_DTYPE),                 # (84, 10)
        "fc3_b": params["fc3_b"].reshape(1, -1).astype(f32),
    }


def net_forward(prep, x):
    """x: (N, 3, 32, 32) NCHW float32 -> logits (N, 10) float32."""
    n = x.shape[0]

    # Stage 1: conv1(3->6,5x5) + ReLU + maxpool(2,2); channel-major activations.
    xc = jnp.transpose(x, (1, 0, 2, 3))                                 # (3, N, 32, 32)
    p1, mp1, (h1, w1), tc1 = pool_patches_wide(xc, 5, 5, tile_cap=1024)
    a1 = conv_relu_pool(p1, prep["c1_w"], prep["c1_b"], tile_cols=tc1)  # (8, Mp1_pad) bf16
    a1 = a1[:6, :mp1].reshape(6, n, h1, w1)                             # (6, N, 14, 14)

    # Stage 2: conv2(6->16,5x5) + ReLU + maxpool(2,2); input already (C,N,H,W).
    p2, mp2, (h2, w2), tc2 = pool_patches_wide(a1, 5, 5, tile_cap=512)
    a2 = conv_relu_pool(p2, prep["c2_w"], prep["c2_b"], tile_cols=tc2)  # (16, Mp2_pad) bf16
    a2 = a2[:, :mp2].reshape(16, n, h2 * w2)                            # (16, N, 25)

    # Flatten exactly like torch's x.view(-1, 16*5*5) on an NCHW tensor.
    x_fc = a2.transpose(1, 0, 2).reshape(n, 16 * h2 * w2)               # (N, 400)
    x_fc = x_fc.astype(MATMUL_DTYPE)

    # Stage 3: fused FC stack (fc1 + ReLU + fc2 + ReLU + fc3) in one kernel.
    return mlp3(x_fc,
                prep["fc1_w"], prep["fc1_b"],
                prep["fc2_w"], prep["fc2_b"],
                prep["fc3_w"], prep["fc3_b"])


if __name__ == "__main__":
    key = jax.random.PRNGKey(0)
    k_params, k_x = jax.random.split(key)

    params = init_params(k_params)
    prep = prepare_params(params)

    # 3-channel 32x32 input (CIFAR-like) so the 16*5*5 flatten holds; batch 2.
    x = jax.random.normal(k_x, (2, 3, 32, 32), jnp.float32)

    fwd = jax.jit(net_forward)
    out = jax.block_until_ready(fwd(prep, x))

    assert out.shape == (2, 10), out.shape
    assert out.dtype == jnp.float32
    print("KERNEL_OK")
</pallas_src>

<mosaic_0001>
module attributes {stable_mosaic.version = 11 : i64} {
  func.func @_conv_relu_pool_kernel(%arg0: i32, %arg1: memref<75x1024xbf16, #tpu.memory_space<vmem>>, %arg2: memref<8x75xbf16, #tpu.memory_space<vmem>>, %arg3: memref<8x1xf32, #tpu.memory_space<vmem>>, %arg4: memref<8x256xbf16, #tpu.memory_space<vmem>>) attributes {dimension_semantics = [#tpu.dimension_semantics<parallel>], iteration_bounds = array<i64: 2>, scalar_prefetch = 0 : i64, scratch_operands = 0 : i64, tpu.core_type = #tpu.core_type<tc>, window_params = [{transform_indices = @transform_0, window_bounds = array<i64: 75, 1024>}, {pipeline_mode = #tpu.pipeline_mode<synchronous>, transform_indices = @transform_1, window_bounds = array<i64: 8, 75>}, {pipeline_mode = #tpu.pipeline_mode<synchronous>, transform_indices = @transform_2, window_bounds = array<i64: 8, 1>}, {transform_indices = @transform_3, window_bounds = array<i64: 8, 256>}]} {
    %c0 = arith.constant 0 : index
    %c0_0 = arith.constant 0 : index
    %0 = vector.load %arg2[%c0, %c0_0] : memref<8x75xbf16, #tpu.memory_space<vmem>>, vector<8x75xbf16>
    %c0_1 = arith.constant 0 : index
    %c0_2 = arith.constant 0 : index
    %1 = vector.load %arg1[%c0_1, %c0_2] : memref<75x1024xbf16, #tpu.memory_space<vmem>>, vector<75x1024xbf16>
    %cst = arith.constant dense<0.000000e+00> : vector<8x1024xf32>
    %2 = tpu.matmul %0, %1, %cst {dimension_numbers = #tpu.dot_dimension_numbers<[1], [0], [0], [1], [0, 0, 1, 1], [], []>} : vector<8x75xbf16>, vector<75x1024xbf16>, vector<8x1024xf32> -> vector<8x1024xf32>
    %3 = vector.extract_strided_slice %2 {offsets = [0, 0], sizes = [8, 256], strides = [1, 1]} : vector<8x1024xf32> to vector<8x256xf32>
    %4 = vector.extract_strided_slice %2 {offsets = [0, 256], sizes = [8, 256], strides = [1, 1]} : vector<8x1024xf32> to vector<8x256xf32>
    %5 = arith.maximumf %3, %4 : vector<8x256xf32>
    %6 = vector.extract_strided_slice %2 {offsets = [0, 512], sizes = [8, 256], strides = [1, 1]} : vector<8x1024xf32> to vector<8x256xf32>
    %7 = vector.extract_strided_slice %2 {offsets = [0, 768], sizes = [8, 256], strides = [1, 1]} : vector<8x1024xf32> to vector<8x256xf32>
    %8 = arith.maximumf %6, %7 : vector<8x256xf32>
    %9 = arith.maximumf %5, %8 : vector<8x256xf32>
    %c0_3 = arith.constant 0 : index
    %c0_4 = arith.constant 0 : index
    %10 = vector.load %arg3[%c0_3, %c0_4] : memref<8x1xf32, #tpu.memory_space<vmem>>, vector<8x1xf32>
    %11 = vector.broadcast %10 : vector<8x1xf32> to vector<8x256xf32>
    %12 = arith.addf %9, %11 : vector<8x256xf32>
    %cst_5 = arith.constant 0.000000e+00 : f32
    %13 = vector.broadcast %cst_5 : f32 to vector<8x256xf32>
    %14 = arith.maximumf %12, %13 : vector<8x256xf32>
    %15 = arith.truncf %14 : vector<8x256xf32> to vector<8x256xbf16>
    %c0_6 = arith.constant 0 : index
    %c0_7 = arith.constant 0 : index
    %16 = vector.load %arg4[%c0_6, %c0_7] : memref<8x256xbf16, #tpu.memory_space<vmem>>, vector<8x256xbf16>
    tpu.vector_store %arg4[%c0_6, %c0_7], %15 {strides = array<i32>} : memref<8x256xbf16, #tpu.memory_space<vmem>>, vector<8x256xbf16>,
    return
  }
  func.func @transform_0(%arg0: i32) -> (i32, i32) {
    %c0_i32 = arith.constant 0 : i32
    %c0_i32_0 = arith.constant 0 : i32
    return %c0_i32, %arg0 : i32, i32
  }
  func.func @transform_1(%arg0: i32) -> (i32, i32) {
    %c0_i32 = arith.constant 0 : i32
    %c0_i32_0 = arith.constant 0 : i32
    %c0_i32_1 = arith.constant 0 : i32
    return %c0_i32, %c0_i32_0 : i32, i32
  }
  func.func @transform_2(%arg0: i32) -> (i32, i32) {
    %c0_i32 = arith.constant 0 : i32
    %c0_i32_0 = arith.constant 0 : i32
    %c0_i32_1 = arith.constant 0 : i32
    return %c0_i32, %c0_i32_0 : i32, i32
  }
  func.func @transform_3(%arg0: i32) -> (i32, i32) {
    %c0_i32 = arith.constant 0 : i32
    %c0_i32_0 = arith.constant 0 : i32
    return %c0_i32, %arg0 : i32, i32
  }
}

module attributes {stable_mosaic.version = 11 : i64} {
  func.func @_conv_relu_pool_kernel(%arg0: i32, %arg1: memref<150x512xbf16, #tpu.memory_space<vmem>>, %arg2: memref<16x150xbf16, #tpu.memory_space<vmem>>, %arg3: memref<16x1xf32, #tpu.memory_space<vmem>>, %arg4: memref<16x128xbf16, #tpu.memory_space<vmem>>) attributes {dimension_semantics = [#tpu.dimension_semantics<parallel>], iteration_bounds = array<i64: 1>, scalar_prefetch = 0 : i64, scratch_operands = 0 : i64, tpu.core_type = #tpu.core_type<tc>, window_params = [{transform_indices = @transform_0, window_bounds = array<i64: 150, 512>}, {pipeline_mode = #tpu.pipeline_mode<synchronous>, transform_indices = @transform_1, window_bounds = array<i64: 16, 150>}, {pipeline_mode = #tpu.pipeline_mode<synchronous>, transform_indices = @transform_2, window_bounds = array<i64: 16, 1>}, {transform_indices = @transform_3, window_bounds = array<i64: 16, 128>}]} {
    %c0 = arith.constant 0 : index
    %c0_0 = arith.constant 0 : index
    %0 = vector.load %arg2[%c0, %c0_0] : memref<16x150xbf16, #tpu.memory_space<vmem>>, vector<16x150xbf16>
    %c0_1 = arith.constant 0 : index
    %c0_2 = arith.constant 0 : index
    %1 = vector.load %arg1[%c0_1, %c0_2] : memref<150x512xbf16, #tpu.memory_space<vmem>>, vector<150x512xbf16>
    %cst = arith.constant dense<0.000000e+00> : vector<16x512xf32>
    %2 = tpu.matmul %0, %1, %cst {dimension_numbers = #tpu.dot_dimension_numbers<[1], [0], [0], [1], [0, 0, 1, 1], [], []>} : vector<16x150xbf16>, vector<150x512xbf16>, vector<16x512xf32> -> vector<16x512xf32>
    %3 = vector.extract_strided_slice %2 {offsets = [0, 0], sizes = [16, 128], strides = [1, 1]} : vector<16x512xf32> to vector<16x128xf32>
    %4 = vector.extract_strided_slice %2 {offsets = [0, 128], sizes = [16, 128], strides = [1, 1]} : vector<16x512xf32> to vector<16x128xf32>
    %5 = arith.maximumf %3, %4 : vector<16x128xf32>
    %6 = vector.extract_strided_slice %2 {offsets = [0, 256], sizes = [16, 128], strides = [1, 1]} : vector<16x512xf32> to vector<16x128xf32>
    %7 = vector.extract_strided_slice %2 {offsets = [0, 384], sizes = [16, 128], strides = [1, 1]} : vector<16x512xf32> to vector<16x128xf32>
    %8 = arith.maximumf %6, %7 : vector<16x128xf32>
    %9 = arith.maximumf %5, %8 : vector<16x128xf32>
    %c0_3 = arith.constant 0 : index
    %c0_4 = arith.constant 0 : index
    %10 = vector.load %arg3[%c0_3, %c0_4] : memref<16x1xf32, #tpu.memory_space<vmem>>, vector<16x1xf32>
    %11 = vector.broadcast %10 : vector<16x1xf32> to vector<16x128xf32>
    %12 = arith.addf %9, %11 : vector<16x128xf32>
    %cst_5 = arith.constant 0.000000e+00 : f32
    %13 = vector.broadcast %cst_5 : f32 to vector<16x128xf32>
    %14 = arith.maximumf %12, %13 : vector<16x128xf32>
    %15 = arith.truncf %14 : vector<16x128xf32> to vector<16x128xbf16>
    %c0_6 = arith.constant 0 : index
    %c0_7 = arith.constant 0 : index
    %16 = vector.load %arg4[%c0_6, %c0_7] : memref<16x128xbf16, #tpu.memory_space<vmem>>, vector<16x128xbf16>
    tpu.vector_store %arg4[%c0_6, %c0_7], %15 {strides = array<i32>} : memref<16x128xbf16, #tpu.memory_space<vmem>>, vector<16x128xbf16>,
    return
  }
  func.func @transform_0(%arg0: i32) -> (i32, i32) {
    %c0_i32 = arith.constant 0 : i32
    %c0_i32_0 = arith.constant 0 : i32
    return %c0_i32, %arg0 : i32, i32
  }
  func.func @transform_1(%arg0: i32) -> (i32, i32) {
    %c0_i32 = arith.constant 0 : i32
    %c0_i32_0 = arith.constant 0 : i32
    %c0_i32_1 = arith.constant 0 : i32
    return %c0_i32, %c0_i32_0 : i32, i32
  }
  func.func @transform_2(%arg0: i32) -> (i32, i32) {
    %c0_i32 = arith.constant 0 : i32
    %c0_i32_0 = arith.constant 0 : i32
    %c0_i32_1 = arith.constant 0 : i32
    return %c0_i32, %c0_i32_0 : i32, i32
  }
  func.func @transform_3(%arg0: i32) -> (i32, i32) {
    %c0_i32 = arith.constant 0 : i32
    %c0_i32_0 = arith.constant 0 : i32
    return %c0_i32, %arg0 : i32, i32
  }
}

module attributes {stable_mosaic.version = 11 : i64} {
  func.func @_mlp3_kernel(%arg0: i32, %arg1: memref<2x400xbf16, #tpu.memory_space<vmem>>, %arg2: memref<400x120xbf16, #tpu.memory_space<vmem>>, %arg3: memref<1x120xf32, #tpu.memory_space<vmem>>, %arg4: memref<120x84xbf16, #tpu.memory_space<vmem>>, %arg5: memref<1x84xf32, #tpu.memory_space<vmem>>, %arg6: memref<84x10xbf16, #tpu.memory_space<vmem>>, %arg7: memref<1x10xf32, #tpu.memory_space<vmem>>, %arg8: memref<2x10xf32, #tpu.memory_space<vmem>>) attributes {dimension_semantics = [#tpu.dimension_semantics<arbitrary>], iteration_bounds = array<i64: 1>, scalar_prefetch = 0 : i64, scratch_operands = 0 : i64, tpu.core_type = #tpu.core_type<tc>, window_params = [{pipeline_mode = #tpu.pipeline_mode<synchronous>, transform_indices = @transform_0, window_bounds = array<i64: 2, 400>}, {pipeline_mode = #tpu.pipeline_mode<synchronous>, transform_indices = @transform_1, window_bounds = array<i64: 400, 120>}, {pipeline_mode = #tpu.pipeline_mode<synchronous>, transform_indices = @transform_2, window_bounds = array<i64: 1, 120>}, {pipeline_mode = #tpu.pipeline_mode<synchronous>, transform_indices = @transform_3, window_bounds = array<i64: 120, 84>}, {pipeline_mode = #tpu.pipeline_mode<synchronous>, transform_indices = @transform_4, window_bounds = array<i64: 1, 84>}, {pipeline_mode = #tpu.pipeline_mode<synchronous>, transform_indices = @transform_5, window_bounds = array<i64: 84, 10>}, {pipeline_mode = #tpu.pipeline_mode<synchronous>, transform_indices = @transform_6, window_bounds = array<i64: 1, 10>}, {pipeline_mode = #tpu.pipeline_mode<synchronous>, transform_indices = @transform_7, window_bounds = array<i64: 2, 10>}]} {
    %c0 = arith.constant 0 : index
    %c0_0 = arith.constant 0 : index
    %0 = vector.load %arg1[%c0, %c0_0] : memref<2x400xbf16, #tpu.memory_space<vmem>>, vector<2x400xbf16>
    %c0_1 = arith.constant 0 : index
    %c0_2 = arith.constant 0 : index
    %1 = vector.load %arg2[%c0_1, %c0_2] : memref<400x120xbf16, #tpu.memory_space<vmem>>, vector<400x120xbf16>
    %cst = arith.constant dense<0.000000e+00> : vector<2x120xf32>
    %2 = tpu.matmul %0, %1, %cst {dimension_numbers = #tpu.dot_dimension_numbers<[1], [0], [0], [1], [0, 0, 1, 1], [], []>} : vector<2x400xbf16>, vector<400x120xbf16>, vector<2x120xf32> -> vector<2x120xf32>
    %c0_3 = arith.constant 0 : index
    %c0_4 = arith.constant 0 : index
    %3 = vector.load %arg3[%c0_3, %c0_4] : memref<1x120xf32, #tpu.memory_space<vmem>>, vector<1x120xf32>
    %4 = vector.broadcast %3 : vector<1x120xf32> to vector<2x120xf32>
    %5 = arith.addf %2, %4 : vector<2x120xf32>
    %cst_5 = arith.constant 0.000000e+00 : f32
    %6 = vector.broadcast %cst_5 : f32 to vector<2x120xf32>
    %7 = arith.maximumf %5, %6 : vector<2x120xf32>
    %8 = arith.truncf %7 : vector<2x120xf32> to vector<2x120xbf16>
    %c0_6 = arith.constant 0 : index
    %c0_7 = arith.constant 0 : index
    %9 = vector.load %arg4[%c0_6, %c0_7] : memref<120x84xbf16, #tpu.memory_space<vmem>>, vector<120x84xbf16>
    %cst_8 = arith.constant dense<0.000000e+00> : vector<2x84xf32>
    %10 = tpu.matmul %8, %9, %cst_8 {dimension_numbers = #tpu.dot_dimension_numbers<[1], [0], [0], [1], [0, 0, 1, 1], [], []>} : vector<2x120xbf16>, vector<120x84xbf16>, vector<2x84xf32> -> vector<2x84xf32>
    %c0_9 = arith.constant 0 : index
    %c0_10 = arith.constant 0 : index
    %11 = vector.load %arg5[%c0_9, %c0_10] : memref<1x84xf32, #tpu.memory_space<vmem>>, vector<1x84xf32>
    %12 = vector.broadcast %11 : vector<1x84xf32> to vector<2x84xf32>
    %13 = arith.addf %10, %12 : vector<2x84xf32>
    %cst_11 = arith.constant 0.000000e+00 : f32
    %14 = vector.broadcast %cst_11 : f32 to vector<2x84xf32>
    %15 = arith.maximumf %13, %14 : vector<2x84xf32>
    %16 = arith.truncf %15 : vector<2x84xf32> to vector<2x84xbf16>
    %c0_12 = arith.constant 0 : index
    %c0_13 = arith.constant 0 : index
    %17 = vector.load %arg6[%c0_12, %c0_13] : memref<84x10xbf16, #tpu.memory_space<vmem>>, vector<84x10xbf16>
    %cst_14 = arith.constant dense<0.000000e+00> : vector<2x10xf32>
    %18 = tpu.matmul %16, %17, %cst_14 {dimension_numbers = #tpu.dot_dimension_numbers<[1], [0], [0], [1], [0, 0, 1, 1], [], []>} : vector<2x84xbf16>, vector<84x10xbf16>, vector<2x10xf32> -> vector<2x10xf32>
    %c0_15 = arith.constant 0 : index
    %c0_16 = arith.constant 0 : index
    %19 = vector.load %arg7[%c0_15, %c0_16] : memref<1x10xf32, #tpu.memory_space<vmem>>, vector<1x10xf32>
    %20 = vector.broadcast %19 : vector<1x10xf32> to vector<2x10xf32>
    %21 = arith.addf %18, %20 : vector<2x10xf32>
    %c0_17 = arith.constant 0 : index
    %c0_18 = arith.constant 0 : index
    %22 = vector.load %arg8[%c0_17, %c0_18] : memref<2x10xf32, #tpu.memory_space<vmem>>, vector<2x10xf32>
    tpu.vector_store %arg8[%c0_17, %c0_18], %21 {strides = array<i32>} : memref<2x10xf32, #tpu.memory_space<vmem>>, vector<2x10xf32>,
    return
  }
  func.func @transform_0(%arg0: i32) -> (i32, i32) {
    %c0_i32 = arith.constant 0 : i32
    %c0_i32_0 = arith.constant 0 : i32
    %c0_i32_1 = arith.constant 0 : i32
    return %c0_i32, %c0_i32_0 : i32, i32
  }
  func.func @transform_1(%arg0: i32) -> (i32, i32) {
    %c0_i32 = arith.constant 0 : i32
    %c0_i32_0 = arith.constant 0 : i32
    %c0_i32_1 = arith.constant 0 : i32
    return %c0_i32, %c0_i32_0 : i32, i32
  }
  func.func @transform_2(%arg0: i32) -> (i32, i32) {
    %c0_i32 = arith.constant 0 : i32
    %c0_i32_0 = arith.constant 0 : i32
    %c0_i32_1 = arith.constant 0 : i32
    return %c0_i32, %c0_i32_0 : i32, i32
  }
  func.func @transform_3(%arg0: i32) -> (i32, i32) {
    %c0_i32 = arith.constant 0 : i32
    %c0_i32_0 = arith.constant 0 : i32
    %c0_i32_1 = arith.constant 0 : i32
    return %c0_i32, %c0_i32_0 : i32, i32
  }
  func.func @transform_4(%arg0: i32) -> (i32, i32) {
    %c0_i32 = arith.constant 0 : i32
    %c0_i32_0 = arith.constant 0 : i32
    %c0_i32_1 = arith.constant 0 : i32
    return %c0_i32, %c0_i32_0 : i32, i32
  }
  func.func @transform_5(%arg0: i32) -> (i32, i32) {
    %c0_i32 = arith.constant 0 : i32
    %c0_i32_0 = arith.constant 0 : i32
    %c0_i32_1 = arith.constant 0 : i32
    return %c0_i32, %c0_i32_0 : i32, i32
  }
  func.func @transform_6(%arg0: i32) -> (i32, i32) {
    %c0_i32 = arith.constant 0 : i32
    %c0_i32_0 = arith.constant 0 : i32
    %c0_i32_1 = arith.constant 0 : i32
    return %c0_i32, %c0_i32_0 : i32, i32
  }
  func.func @transform_7(%arg0: i32) -> (i32, i32) {
    %c0_i32 = arith.constant 0 : i32
    %c0_i32_0 = arith.constant 0 : i32
    %c0_i32_1 = arith.constant 0 : i32
    return %c0_i32, %c0_i32_0 : i32, i32
  }
}

</mosaic_0001>

<bundles_post_ra>
// kernel: net_forward.3
= control target key start
LH: loop header
LB: loop body
LE: loop exit
PB: predicated region body
PF: predicated region fallthrough
CT: control target
= control target key end

     0   :  { %s921_s12 = smov 0   ;;  %s923_s13 = smov 0   ;;  %s1124_s0 = inlined_call_operand.vmem [shape: bf16[75,2048], index: 0, kind: input, shape index: {}]   ;;  %s1125_s1 = inlined_call_operand.vmem [shape: bf16[8,75], index: 1, kind: input, shape index: {}]   ;;  %s1126_s2 = inlined_call_operand.vmem [shape: f32[8,1], index: 2, kind: input, shape index: {}]   ;;  %s1127_s3 = inlined_call_operand.vmem [shape: bf16[8,512], index: 3, kind: output, shape index: {}]  }
   0x1   :  { %s925_s14 = smov 0  }
   0x2 LB: > { %s788_s15 = sadd.s32 4294967295, %s897_s14   ;;  %s938_s16 = sadd.s32 1, %s897_s14   ;;  %s897_s14 = sphi %s925_s14, %s1130_s14   ;;  %s893_s13 = sphi %s923_s13, %s1129_s13   ;;  %s889_s12 = sphi %s921_s12, %s1128_s12  }
   0x3   : > { %s17_s17 = ssub.s32 %s897_s14, %s938_s16  ;;  %s20_s18 = sadd.s32 1, %s893_s13 }
   0x4   : > { %p18_p0 = scmp.eq.s32.totalorder %s17_s17, 0  ;;  %p27_p1 = scmp.ne.s32.totalorder %s893_s13, %s889_s12 }
   0x5   : > { %p28_p2 = scmp.eq.s32.totalorder %s897_s14, 0  ;;  %p791_p4 = scmp.ge.s32.totalorder %s897_s14, 2 }
   0x6   : > { %s947_s19 = scalar_select %p18_p0, %s893_s13, %s20_s18  }
   0x7   : > { %p29_p3 = por %p28_p2, %p27_p1  ;;  %127 = sbr.rel (%p791_p4) target bundleno = 39 (0x27), region = 24 }
   0xe   : > { %130 = sbr.rel (!%p29_p3) target bundleno = 39 (0x27), region = 28  ;;  %s132_s20 = sand.u32 (%p29_p3), 1, %s893_s13  }
   0xf   : > { %s844_s21 = sshll.u32 (%p29_p3), %s897_s14, 5  ;;  %s846_s22 = smul.u32 (%p29_p3), 320, %s132_s20 }
  0x10   : > { %s955_s25 = scalar_lea.vmem (%p29_p3), %s1124_s0, %s844_s21 }
  0x11   : > { %v150_v0 = vld [vmem:[%s955_s25] sm:$0xff] (%p29_p3)  ;;  %v152_v1 = vld [vmem:[%s955_s25 + $0x8] sm:$0xff] (%p29_p3)  ;;  %v154_v2 = vld [vmem:[%s955_s25 + $0x10] sm:$0xff] (%p29_p3)  ;;  %s963_s26 = scalar_lea.vmem (%p29_p3), [#allocation2], %s846_s22 }
  0x12   : > { %v156_v3 = vld [vmem:[%s955_s25 + $0x18] sm:$0xff] (%p29_p3)  ;;  %v158_v4 = vld [vmem:[%s955_s25 + $0x40] sm:$0xff] (%p29_p3)  ;;  %v160_v5 = vld [vmem:[%s955_s25 + $0x48] sm:$0xff] (%p29_p3)  ;;  %151 = vst [vmem:[%s963_s26] sm:$0xff] (%p29_p3), %v150_v0 }
  0x13   : > { %153 = vst [vmem:[%s963_s26 + $0x8] sm:$0xff] (%p29_p3), %v152_v1  ;;  %155 = vst [vmem:[%s963_s26 + $0x10] sm:$0xff] (%p29_p3), %v154_v2  ;;  %v162_v6 = vld [vmem:[%s955_s25 + $0x50] sm:$0xff] (%p29_p3)  ;;  %v164_v7 = vld [vmem:[%s955_s25 + $0x58] sm:$0xff] (%p29_p3) }
  0x14   : > { %157 = vst [vmem:[%s963_s26 + $0x18] sm:$0xff] (%p29_p3), %v156_v3  ;;  %159 = vst [vmem:[%s963_s26 + $0x20] sm:$0xff] (%p29_p3), %v158_v4  ;;  %v166_v8 = vld [vmem:[%s955_s25 + $0x80] sm:$0xff] (%p29_p3)  ;;  %v168_v9 = vld [vmem:[%s955_s25 + $0x88] sm:$0xff] (%p29_p3) }
  0x15   : > { %161 = vst [vmem:[%s963_s26 + $0x28] sm:$0xff] %v160_v5  ;;  %163 = vst [vmem:[%s963_s26 + $0x30] sm:$0xff] %v162_v6  ;;  %v170_v10 = vld [vmem:[%s955_s25 + $0x90] sm:$0xff]  ;;  %v172_v11 = vld [vmem:[%s955_s25 + $0x98] sm:$0xff] }
  0x16   : > { %165 = vst [vmem:[%s963_s26 + $0x38] sm:$0xff] %v164_v7  ;;  %167 = vst [vmem:[%s963_s26 + $0x40] sm:$0xff] %v166_v8  ;;  %v174_v12 = vld [vmem:[%s955_s25 + $0xc0] sm:$0xff]  ;;  %v176_v13 = vld [vmem:[%s955_s25 + $0xc8] sm:$0xff] }
  0x17   : > { %169 = vst [vmem:[%s963_s26 + $0x48] sm:$0xff] %v168_v9  ;;  %171 = vst [vmem:[%s963_s26 + $0x50] sm:$0xff] %v170_v10  ;;  %v178_v14 = vld [vmem:[%s955_s25 + $0xd0] sm:$0xff]  ;;  %v180_v15 = vld [vmem:[%s955_s25 + $0xd8] sm:$0xff] }
  0x18   : > { %173 = vst [vmem:[%s963_s26 + $0x58] sm:$0xff] %v172_v11  ;;  %175 = vst [vmem:[%s963_s26 + $0x60] sm:$0xff] %v174_v12  ;;  %v182_v16 = vld [vmem:[%s955_s25 + $0x100] sm:$0xff]  ;;  %v184_v17 = vld [vmem:[%s955_s25 + $0x108] sm:$0xff] }
  0x19   : > { %177 = vst [vmem:[%s963_s26 + $0x68] sm:$0xff] %v176_v13  ;;  %179 = vst [vmem:[%s963_s26 + $0x70] sm:$0xff] %v178_v14  ;;  %v186_v18 = vld [vmem:[%s955_s25 + $0x110] sm:$0xff]  ;;  %v188_v19 = vld [vmem:[%s955_s25 + $0x118] sm:$0xff] }
  0x1a   : > { %181 = vst [vmem:[%s963_s26 + $0x78] sm:$0xff] %v180_v15  ;;  %183 = vst [vmem:[%s963_s26 + $0x80] sm:$0xff] %v182_v16  ;;  %v190_v20 = vld [vmem:[%s955_s25 + $0x140] sm:$0xff]  ;;  %v192_v21 = vld [vmem:[%s955_s25 + $0x148] sm:$0xff] }
  0x1b   : > { %185 = vst [vmem:[%s963_s26 + $0x88] sm:$0xff] %v184_v17  ;;  %187 = vst [vmem:[%s963_s26 + $0x90] sm:$0xff] %v186_v18  ;;  %v194_v22 = vld [vmem:[%s955_s25 + $0x150] sm:$0xff]  ;;  %v196_v23 = vld [vmem:[%s955_s25 + $0x158] sm:$0xff] }
  0x1c   : > { %189 = vst [vmem:[%s963_s26 + $0x98] sm:$0xff] %v188_v19  ;;  %191 = vst [vmem:[%s963_s26 + $0xa0] sm:$0xff] %v190_v20  ;;  %v198_v24 = vld [vmem:[%s955_s25 + $0x180] sm:$0xff]  ;;  %v200_v25 = vld [vmem:[%s955_s25 + $0x188] sm:$0xff] }
  0x1d   : > { %193 = vst [vmem:[%s963_s26 + $0xa8] sm:$0xff] %v192_v21  ;;  %195 = vst [vmem:[%s963_s26 + $0xb0] sm:$0xff] %v194_v22  ;;  %v202_v26 = vld [vmem:[%s955_s25 + $0x190] sm:$0xff]  ;;  %v204_v27 = vld [vmem:[%s955_s25 + $0x198] sm:$0xff] }
  0x1e   : > { %197 = vst [vmem:[%s963_s26 + $0xb8] sm:$0xff] %v196_v23  ;;  %199 = vst [vmem:[%s963_s26 + $0xc0] sm:$0xff] %v198_v24  ;;  %v206_v28 = vld [vmem:[%s955_s25 + $0x1c0] sm:$0xff]  ;;  %v208_v29 = vld [vmem:[%s955_s25 + $0x1c8] sm:$0xff] }
  0x1f   : > { %201 = vst [vmem:[%s963_s26 + $0xc8] sm:$0xff] %v200_v25  ;;  %203 = vst [vmem:[%s963_s26 + $0xd0] sm:$0xff] %v202_v26  ;;  %v210_v30 = vld [vmem:[%s955_s25 + $0x1d0] sm:$0xff]  ;;  %v212_v31 = vld [vmem:[%s955_s25 + $0x1d8] sm:$0xff] }
  0x20   : > { %205 = vst [vmem:[%s963_s26 + $0xd8] sm:$0xff] %v204_v27  ;;  %207 = vst [vmem:[%s963_s26 + $0xe0] sm:$0xff] %v206_v28  ;;  %v214_v32 = vld [vmem:[%s955_s25 + $0x200] sm:$0xff]  ;;  %v216_v33 = vld [vmem:[%s955_s25 + $0x208] sm:$0xff] }
  0x21   : > { %209 = vst [vmem:[%s963_s26 + $0xe8] sm:$0xff] %v208_v29  ;;  %211 = vst [vmem:[%s963_s26 + $0xf0] sm:$0xff] %v210_v30  ;;  %v218_v34 = vld [vmem:[%s955_s25 + $0x210] sm:$0xff]  ;;  %v220_v35 = vld [vmem:[%s955_s25 + $0x218] sm:$0xff] }
  0x22   : > { %213 = vst [vmem:[%s963_s26 + $0xf8] sm:$0xff] %v212_v31  ;;  %215 = vst [vmem:[%s963_s26 + $0x100] sm:$0xff] %v214_v32  ;;  %v222_v36 = vld [vmem:[%s955_s25 + $0x240] sm:$0xff]  ;;  %v224_v37 = vld [vmem:[%s955_s25 + $0x248] sm:$0xff] }
  0x23   : > { %217 = vst [vmem:[%s963_s26 + $0x108] sm:$0xff] %v216_v33  ;;  %219 = vst [vmem:[%s963_s26 + $0x110] sm:$0xff] %v218_v34  ;;  %v226_v38 = vld [vmem:[%s955_s25 + $0x250] sm:$0xff]  ;;  %v228_v39 = vld [vmem:[%s955_s25 + $0x258] sm:$0xff] }
  0x24   : > { %221 = vst [vmem:[%s963_s26 + $0x118] sm:$0xff] %v220_v35  ;;  %223 = vst [vmem:[%s963_s26 + $0x120] sm:$0xff] %v222_v36 }
  0x25   : > { %225 = vst [vmem:[%s963_s26 + $0x128] sm:$0xff] %v224_v37  ;;  %227 = vst [vmem:[%s963_s26 + $0x130] sm:$0xff] %v226_v38 }
  0x26   : > { %229 = vst [vmem:[%s963_s26 + $0x138] sm:$0xff] %v228_v39 }
  0x27 PF: > { %p794_p5 = scmp.ge.s32.totalorder %s897_s14, 1  ;;  %p234_p6 = scmp.lt.s32.totalorder %s897_s14, 3 }
  0x29   : > { %p235_p7 = pnand %p794_p5, %p234_p6 }
  0x2a   : > { %s241_s27 = sand.u32 (!%p235_p7), 1, %s889_s12   ;;  %v707_v40 = vld [vmem:[%s1126_s2] sm:$0xff] (!%p235_p7)  ;;  %v899_v41 = vmov (!%p235_p7), 0   ;;  %vm509_vm0 = vcmask (!%p235_p7), 1044480   ;;  %vm510_vm1 = vcmask (!%p235_p7), 1045504   ;;  %v900_v6 = vmov (!%p235_p7), 65535  }
  0x2b   : > { %238 = sbr.rel (%p235_p7) target bundleno = 315 (0x13b), region = 51  ;;  %569 = vmatprep.mubr.bf16.mxu0 (!%p235_p7), %v899_v41  ;;  %610 = vmatprep.mubr.bf16.mxu1 (!%p235_p7), %v899_v41  ;;  %v511_v7 = vsel (!%p235_p7), %vm509_vm0, 4294967295, %v900_v6  ;;  %v272_v35 = vld [vmem:[%s1125_s1] sm:$0xf] (!%p235_p7)  ;;  %vm505_vm2 = vcmask (!%p235_p7), 613376   ;;  %s795_s7 = sshll.u32 (!%p235_p7), %s788_s15, 1 }
  0x2c   : > { %s847_s30 = smul.u32 (!%p235_p7), 320, %s241_s27  ;;  %874 = vset.pattern.permute.xlu0 (!%p235_p7), %v899_v41  ;;  %v1070_v15 = vsel (!%p235_p7), %vm510_vm1, %v511_v7, 0  ;;  %p266_p8 = scmp.lt.s32.totalorder (!%p235_p7), %s795_s7, 3 }
  0x2d   : > { %710 = vperm.xlu0 (!%p235_p7), %874, %v707_v40  }
  0x2e   : > { %s1048_s4 = scalar_lea.vmem (!%p235_p7), [#allocation2], %s847_s30 }
  0x2f   : > { %v273_v42 = vld [vmem:[%s1048_s4] sm:$0xff] (!%p235_p7)  ;;  %v274_v44 = vld [vmem:[%s1048_s4 + $0x8] sm:$0xff] (!%p235_p7)  ;;  %v275_v23 = vld [vmem:[%s1048_s4 + $0x10] sm:$0xff] (!%p235_p7) }
  0x30   : > { %v277_v43 = vld [vmem:[%s1048_s4 + $0x20] sm:$0xff] (!%p235_p7)  ;;  %v278_v46 = vld [vmem:[%s1048_s4 + $0x28] sm:$0xff] (!%p235_p7)  ;;  %v279_v24 = vld [vmem:[%s1048_s4 + $0x30] sm:$0xff] (!%p235_p7) }
  0x31   : > { %v798_v45 = vcombine.high (!%p235_p7), %v273_v42, %v277_v43  ;;  %v797_v47 = vcombine.low (!%p235_p7), %v273_v42, %v277_v43  ;;  %v281_v48 = vld [vmem:[%s1048_s4 + $0x40] sm:$0xff] (!%p235_p7)  ;;  %v800_v50 = vcombine.high (!%p235_p7), %v274_v44, %v278_v46  ;;  %v799_v51 = vcombine.low (!%p235_p7), %v274_v44, %v278_v46  ;;  %v282_v53 = vld [vmem:[%s1048_s4 + $0x48] sm:$0xff] (!%p235_p7)  ;;  %v276_v25 = vld [vmem:[%s1048_s4 + $0x18] sm:$0xff] (!%p235_p7) }
  0x32   : > { %v285_v49 = vld [vmem:[%s1048_s4 + $0x60] sm:$0xff]  ;;  %v286_v54 = vld [vmem:[%s1048_s4 + $0x68] sm:$0xff]  ;;  %v280_v26 = vld [vmem:[%s1048_s4 + $0x38] sm:$0xff]  ;;  %v802_v29 = vcombine.high %v275_v23, %v279_v24  ;;  %v801_v36 = vcombine.low %v275_v23, %v279_v24  ;;  %s1132_s7 = smov (!%p266_p8, %s795_s7), 3 }
  0x33   : > { %v806_v52 = vcombine.high %v281_v48, %v285_v49  ;;  %v289_v55 = vld [vmem:[%s1048_s4 + $0x80] sm:$0xff]  ;;  %537 = vmatprep.subr.bf16.mxu0 %v798_v45  ;;  %v808_v56 = vcombine.high %v282_v53, %v286_v54  ;;  %v290_v58 = vld [vmem:[%s1048_s4 + $0x88] sm:$0xff]  ;;  %578 = vmatprep.subr.bf16.mxu1 %v800_v50  ;;  %v805_v60 = vcombine.low %v281_v48, %v285_v49  ;;  %v283_v31 = vld [vmem:[%s1048_s4 + $0x50] sm:$0xff]  ;;  %s796_s8 = sshll.u32 %s1132_s7, 2 }
  0x34   : > { %v293_v57 = vld [vmem:[%s1048_s4 + $0xa0] sm:$0xff]  ;;  %v294_v59 = vld [vmem:[%s1048_s4 + $0xa8] sm:$0xff]  ;;  %538 = vmatpush1.bf16.msra.mxu0 %v797_v47  ;;  %579 = vmatpush1.bf16.msra.mxu1 %v799_v51  ;;  %v807_v61 = vcombine.low %v282_v53, %v286_v54  ;;  %v804_v30 = vcombine.high %v276_v25, %v280_v26  ;;  %v287_v32 = vld [vmem:[%s1048_s4 + $0x70] sm:$0xff]  ;;  %v803_v37 = vcombine.low %v276_v25, %v280_v26  ;;  %s269_s11 = scalar_lea.vmem %s1127_s3, %s796_s8 }
  0x35   : > { %539 = vmatprep.subr.bf16.mxu0 %v806_v52  ;;  %v814_v62 = vcombine.high %v289_v55, %v293_v57  ;;  %v297_v63 = vld [vmem:[%s1048_s4 + $0xc0] sm:$0xff]  ;;  %580 = vmatprep.subr.bf16.mxu1 %v808_v56  ;;  %v816_v1 = vcombine.high %v290_v58, %v294_v59  ;;  %v298_v2 = vld [vmem:[%s1048_s4 + $0xc8] sm:$0xff]  ;;  %v813_v10 = vcombine.low %v289_v55, %v293_v57  ;;  %v284_v33 = vld [vmem:[%s1048_s4 + $0x58] sm:$0xff] }
  0x36   : > { %v301_v0 = vld [vmem:[%s1048_s4 + $0xe0] sm:$0xff]  ;;  %v302_v5 = vld [vmem:[%s1048_s4 + $0xe8] sm:$0xff]  ;;  %v815_v11 = vcombine.low %v290_v58, %v294_v59  ;;  %v288_v34 = vld [vmem:[%s1048_s4 + $0x78] sm:$0xff]  ;;  %v810_v38 = vcombine.high %v283_v31, %v287_v32  ;;  %v809_v45 = vcombine.low %v283_v31, %v287_v32 }
  0x37   : > { %v305_v3 = vld [vmem:[%s1048_s4 + $0x100] sm:$0xff]  ;;  %v306_v8 = vld [vmem:[%s1048_s4 + $0x108] sm:$0xff]  ;;  %v822_v12 = vcombine.high %v297_v63, %v301_v0  ;;  %v824_v14 = vcombine.high %v298_v2, %v302_v5  ;;  %v821_v17 = vcombine.low %v297_v63, %v301_v0  ;;  %v823_v19 = vcombine.low %v298_v2, %v302_v5  ;;  %v291_v40 = vld [vmem:[%s1048_s4 + $0x90] sm:$0xff] }
  0x38   : > { %v309_v4 = vld [vmem:[%s1048_s4 + $0x120] sm:$0x33]  ;;  %v310_v9 = vld [vmem:[%s1048_s4 + $0x128] sm:$0x33]  ;;  %540 = vmatpush1.bf16.msra.mxu0 %v805_v60  ;;  %581 = vmatpush1.bf16.msra.mxu1 %v807_v61  ;;  %v812_v39 = vcombine.high %v284_v33, %v288_v34  ;;  %v295_v42 = vld [vmem:[%s1048_s4 + $0xb0] sm:$0xff]  ;;  %v811_v46 = vcombine.low %v284_v33, %v288_v34 }
  0x39   : > { %541 = vmatprep.subr.bf16.mxu0 %v814_v62  ;;  %v830_v13 = vcombine.high %v305_v3, %v309_v4  ;;  %582 = vmatprep.subr.bf16.mxu1 %v816_v1  ;;  %v832_v16 = vcombine.high %v306_v8, %v310_v9  ;;  %v829_v18 = vcombine.low %v305_v3, %v309_v4  ;;  %v292_v43 = vld [vmem:[%s1048_s4 + $0x98] sm:$0xff]  ;;  %v299_v48 = vld [vmem:[%s1048_s4 + $0xd0] sm:$0xff] }
  0x3a   : > { %v831_v21 = vcombine.low %v306_v8, %v310_v9  ;;  %v296_v44 = vld [vmem:[%s1048_s4 + $0xb8] sm:$0xff]  ;;  %v818_v47 = vcombine.high %v291_v40, %v295_v42  ;;  %v303_v49 = vld [vmem:[%s1048_s4 + $0xf0] sm:$0xff]  ;;  %v817_v57 = vcombine.low %v291_v40, %v295_v42 }
  0x3b   : > { %v517_v20 = vand.u32 %v830_v13, %v1070_v15  ;;  %v523_v22 = vand.u32 %v832_v16, %v1070_v15  ;;  %v514_v27 = vand.u32 %v829_v18, %v1070_v15  ;;  %v820_v50 = vcombine.high %v292_v43, %v296_v44  ;;  %v300_v51 = vld [vmem:[%s1048_s4 + $0xd8] sm:$0xff]  ;;  %v307_v52 = vld [vmem:[%s1048_s4 + $0x110] sm:$0xff] }
  0x3c   : > { %542 = vmatpush1.bf16.msra.mxu0 %v813_v10  ;;  %583 = vmatpush1.bf16.msra.mxu1 %v815_v11  ;;  %v520_v28 = vand.u32 %v831_v21, %v1070_v15  ;;  %v311_v53 = vld [vmem:[%s1048_s4 + $0x130] sm:$0x33]  ;;  %v304_v54 = vld [vmem:[%s1048_s4 + $0xf8] sm:$0xff]  ;;  %v819_v58 = vcombine.low %v292_v43, %v296_v44  ;;  %v826_v59 = vcombine.high %v299_v48, %v303_v49 }
  0x3d   : > { %543 = vmatprep.subr.bf16.mxu0 %v822_v12  ;;  %584 = vmatprep.subr.bf16.mxu1 %v824_v14  ;;  %v308_v55 = vld [vmem:[%s1048_s4 + $0x118] sm:$0xff]  ;;  %v834_v60 = vcombine.high %v307_v52, %v311_v53  ;;  %v828_v61 = vcombine.high %v300_v51, %v304_v54  ;;  %v825_v63 = vcombine.low %v299_v48, %v303_v49 }
  0x3e   : > { %v312_v56 = vld [vmem:[%s1048_s4 + $0x138] sm:$0x33]  ;;  %v833_v0 = vcombine.low %v307_v52, %v311_v53  ;;  %v827_v1 = vcombine.low %v300_v51, %v304_v54 }
  0x3f   : > { %v836_v62 = vcombine.high %v308_v55, %v312_v56  ;;  %v529_v2 = vand.u32 %v834_v60, %v1070_v15  ;;  %v835_v3 = vcombine.low %v308_v55, %v312_v56 }
  0x40   : > { %544 = vmatpush1.bf16.msra.mxu0 %v821_v17  ;;  %585 = vmatpush1.bf16.msra.mxu1 %v823_v19  ;;  %v526_v4 = vand.u32 %v833_v0, %v1070_v15 }
  0x41   : > { %545 = vmatprep.subr.bf16.mxu0 %v517_v20  ;;  %586 = vmatprep.subr.bf16.mxu1 %v523_v22  ;;  %v532_v5 = vand.u32 %v835_v3, %v1070_v15 }
  0x44   : > { %546 = vmatpush1.bf16.msra.mxu0 %v514_v27  ;;  %587 = vmatpush1.bf16.msra.mxu1 %v520_v28 }
  0x45   : > { %619 = vmatprep.subr.bf16.mxu0 %v802_v29  ;;  %660 = vmatprep.subr.bf16.mxu1 %v804_v30 }
  0x47   : > { %837 = vmatmul.mubr.msk.bf16.vlgmr.msra.gmra.mrb[0].mxu0 %vm505_vm2, %v272_v35  ;;  %838 = vmatmul.mubr.msk.bf16.vlgmr.msra.gmra.mrb[0].mxu1 %vm505_vm2, %v272_v35 }
  0x48   : > { %620 = vmatpush1.bf16.msra.mxu0 %v801_v36  ;;  %661 = vmatpush1.bf16.msra.mxu1 %v803_v37 }
  0x49   : > { %621 = vmatprep.subr.bf16.mxu0 %v810_v38  ;;  %662 = vmatprep.subr.bf16.mxu1 %v812_v39 }
  0x4a   : > { %651 = vmatprep.mubr.bf16.mxu0 %v899_v41  ;;  %692 = vmatprep.mubr.bf16.mxu1 %v899_v41  ;;  %v535_v41 = vand.u32 %v836_v62, %v1070_v15 }
  0x4c   : > { %622 = vmatpush1.bf16.msra.mxu0 %v809_v45  ;;  %663 = vmatpush1.bf16.msra.mxu1 %v811_v46 }
  0x4d   : > { %623 = vmatprep.subr.bf16.mxu0 %v818_v47  ;;  %664 = vmatprep.subr.bf16.mxu1 %v820_v50 }
  0x50   : > { %624 = vmatpush1.bf16.msra.mxu0 %v817_v57  ;;  %665 = vmatpush1.bf16.msra.mxu1 %v819_v58 }
  0x51   : > { %625 = vmatprep.subr.bf16.mxu0 %v826_v59  ;;  %666 = vmatprep.subr.bf16.mxu1 %v828_v61 }
  0x54   : > { %626 = vmatpush1.bf16.msra.mxu0 %v825_v63  ;;  %667 = vmatpush1.bf16.msra.mxu1 %v827_v1 }
  0x55   : > { %627 = vmatprep.subr.bf16.mxu0 %v529_v2  ;;  %668 = vmatprep.subr.bf16.mxu1 %v535_v41 }
  0x58   : > { %628 = vmatpush1.bf16.msra.mxu0 %v526_v4  ;;  %669 = vmatpush1.bf16.msra.mxu1 %v532_v5 }
  0x5b   : > { %839 = vmatmul.mubr.msk.bf16.vlgmr.msra.gmra.mrb[4].mxu0 %vm505_vm2, %v272_v35  ;;  %840 = vmatmul.mubr.msk.bf16.vlgmr.msra.gmra.mrb[4].mxu1 %vm505_vm2, %v272_v35 }
  0xac   : > { %v711_v17 = vpop.permute.xlu0 %710 }
 0x11a   : > { %v571_v6 = vpop.f32.mrb[0].mxu0  ;;  %v612_v7 = vpop.f32.mrb[0].mxu1 }
 0x11b   : > { %v573_v8 = vpop.f32.mrb[1].mxu0  ;;  %v701_v9 = vmax.f32 %v571_v6, %v612_v7  ;;  %v614_v10 = vpop.f32.mrb[1].mxu1 }
 0x11c   : > { %v575_v11 = vpop.f32.mrb[2].mxu0  ;;  %v702_v12 = vmax.f32 %v573_v8, %v614_v10  ;;  %v616_v13 = vpop.f32.mrb[2].mxu1 }
 0x11d   : > { %v576_v14 = vpop.f32.mrb[3].mxu0  ;;  %v617_v16 = vpop.f32.mrb[3].mxu1 }
 0x12e   : > { %v653_v15 = vpop.f32.mrb[4].mxu0  ;;  %v694_v18 = vpop.f32.mrb[4].mxu1 }
 0x12f   : > { %v655_v19 = vpop.f32.mrb[5].mxu0  ;;  %v703_v20 = vmax.f32 %v653_v15, %v694_v18  ;;  %v696_v21 = vpop.f32.mrb[5].mxu1 }
 0x130   : > { %v657_v22 = vpop.f32.mrb[6].mxu0  ;;  %v704_v23 = vmax.f32 %v655_v19, %v696_v21  ;;  %v698_v24 = vpop.f32.mrb[6].mxu1 }
 0x131   : > { %v658_v25 = vpop.f32.mrb[7].mxu0  ;;  %v699_v26 = vpop.f32.mrb[7].mxu1  ;;  %v705_v27 = vmax.f32 %v701_v9, %v703_v20 }
 0x132   : > { %v706_v28 = vmax.f32 %v702_v12, %v704_v23 }
 0x133   : > { %v713_v29 = vadd.f32 %v711_v17, %v705_v27 }
 0x134   : > { %v714_v30 = vadd.f32 %v711_v17, %v706_v28 }
 0x135   : > { %v715_v31 = vmax.f32 %v713_v29, 0.0 }
 0x136   : > { %v716_v32 = vmax.f32 %v714_v30, 0.0 }
 0x138   : > { %v845_v33 = vpack.c.bf16 %v716_v32, %v715_v31 }
 0x13a   : > { %725 = vst [vmem:[%s269_s11] sm:$0xff] %v845_v33 }
 0x13b PF: > { %p10_p9 = scmp.ge.s32.totalorder %s938_s16, 4   ;;  %s1128_s12 = smov %s893_s13 }
 0x13c   : > { %s1129_s13 = smov %s947_s19  ;;  %s1130_s14 = smov %s938_s16 }
 0x13d   :  { %12 = sbr.rel (!%p10_p9) target bundleno = 2 (0x2), region = 90 }

// kernel: net_forward.4
= control target key start
LH: loop header
LB: loop body
LE: loop exit
PB: predicated region body
PF: predicated region fallthrough
CT: control target
= control target key end

     0   :  { %v511_v1 = vmov 0   ;;  %vm254_vm0 = vcmask 179200   ;;  %vm258_vm1 = vcmask 1042432   ;;  %s661_s0 = inlined_call_operand.vmem [shape: bf16[150,512], index: 0, kind: input, shape index: {}]   ;;  %s662_s1 = inlined_call_operand.vmem [shape: bf16[16,150], index: 1, kind: input, shape index: {}]   ;;  %s663_s2 = inlined_call_operand.vmem [shape: f32[16,1], index: 2, kind: input, shape index: {}]   ;;  %s664_s3 = inlined_call_operand.vmem [shape: bf16[16,128], index: 3, kind: output, shape index: {}]  }
   0x1   :  { %v450_v0 = vld [vmem:[%s661_s0 + $0x4] ss:$16 sps:$4 sm:$0xff]   ;;  %449 = vset.pattern.permute.xlu0 %v511_v1  ;;  %v452_v2 = vld [vmem:[%s661_s0 + $0xc] ss:$16 sps:$4 sm:$0xff]   ;;  %v454_v3 = vld [vmem:[%s661_s0] ss:$16 sps:$4 sm:$0xff]  }
   0x2   :  { %271 = vmatprep.subr.bf16.mxu0 %v450_v0  ;;  %v455_v4 = vld [vmem:[%s661_s0 + $0x8] ss:$16 sps:$4 sm:$0xff]   ;;  %314 = vmatprep.subr.bf16.mxu1 %v452_v2  ;;  %v456_v5 = vld [vmem:[%s661_s0 + $0x24] ss:$16 sps:$4 sm:$0xff]   ;;  %v458_v6 = vld [vmem:[%s661_s0 + $0x2c] ss:$16 sps:$4 sm:$0xff]  }
   0x3   :  { %272 = vmatpush1.bf16.msra.mxu0 %v454_v3  ;;  %315 = vmatpush1.bf16.msra.mxu1 %v455_v4  ;;  %v460_v7 = vld [vmem:[%s661_s0 + $0x20] ss:$16 sps:$4 sm:$0xff]   ;;  %v461_v8 = vld [vmem:[%s661_s0 + $0x28] ss:$16 sps:$4 sm:$0xff]   ;;  %v462_v9 = vld [vmem:[%s661_s0 + $0x44] ss:$16 sps:$4 sm:$0xff]  }
   0x4   :  { %273 = vmatprep.subr.bf16.mxu0 %v456_v5  ;;  %316 = vmatprep.subr.bf16.mxu1 %v458_v6  ;;  %v464_v10 = vld [vmem:[%s661_s0 + $0x4c] ss:$16 sps:$4 sm:$0xff]   ;;  %v466_v11 = vld [vmem:[%s661_s0 + $0x40] ss:$16 sps:$4 sm:$0xff]   ;;  %v467_v12 = vld [vmem:[%s661_s0 + $0x48] ss:$16 sps:$4 sm:$0xff]  }
   0x5   :  { %v468_v13 = vld [vmem:[%s661_s0 + $0x64] ss:$16 sps:$4 sm:$0xff]   ;;  %v470_v14 = vld [vmem:[%s661_s0 + $0x6c] ss:$16 sps:$4 sm:$0xff]   ;;  %v472_v15 = vld [vmem:[%s661_s0 + $0x60] ss:$16 sps:$4 sm:$0xff]  }
   0x6   :  { %v473_v16 = vld [vmem:[%s661_s0 + $0x68] ss:$16 sps:$4 sm:$0xff]   ;;  %v474_v17 = vld [vmem:[%s661_s0 + $0x84] ss:$16 sps:$4 sm:$0xff]   ;;  %v476_v18 = vld [vmem:[%s661_s0 + $0x8c] ss:$16 sps:$4 sm:$0xff]  }
   0x7   :  { %274 = vmatpush1.bf16.msra.mxu0 %v460_v7  ;;  %317 = vmatpush1.bf16.msra.mxu1 %v461_v8  ;;  %v478_v19 = vld [vmem:[%s661_s0 + $0x80] ss:$16 sps:$4 sm:$0xff]   ;;  %v479_v20 = vld [vmem:[%s661_s0 + $0x88] ss:$16 sps:$4 sm:$0xff]   ;;  %v480_v21 = vld [vmem:[%s661_s0 + $0xa4] ss:$16 sps:$4 sm:$0xff]  }
   0x8   :  { %275 = vmatprep.subr.bf16.mxu0 %v462_v9  ;;  %318 = vmatprep.subr.bf16.mxu1 %v464_v10  ;;  %v482_v22 = vld [vmem:[%s661_s0 + $0xac] ss:$16 sps:$4 sm:$0xff]   ;;  %v484_v23 = vld [vmem:[%s661_s0 + $0xa0] ss:$16 sps:$4 sm:$0xff]   ;;  %v485_v24 = vld [vmem:[%s661_s0 + $0xa8] ss:$16 sps:$4 sm:$0xff]  }
   0x9   :  { %v486_v25 = vld [vmem:[%s661_s0 + $0xc4] ss:$16 sps:$4 sm:$0xff]   ;;  %v488_v26 = vld [vmem:[%s661_s0 + $0xcc] ss:$16 sps:$4 sm:$0xff]   ;;  %v490_v27 = vld [vmem:[%s661_s0 + $0xc0] ss:$16 sps:$4 sm:$0xff]  }
   0xa   :  { %v491_v28 = vld [vmem:[%s661_s0 + $0xc8] ss:$16 sps:$4 sm:$0xff]   ;;  %v492_v29 = vld [vmem:[%s661_s0 + $0xe4] ss:$16 sps:$4 sm:$0xff]   ;;  %v494_v30 = vld [vmem:[%s661_s0 + $0xec] ss:$16 sps:$4 sm:$0xff]  }
   0xb   :  { %276 = vmatpush1.bf16.msra.mxu0 %v466_v11  ;;  %319 = vmatpush1.bf16.msra.mxu1 %v467_v12  ;;  %v510_v31 = vld [vmem:[%s662_s1 + $0x4] ss:$8 sps:$4 sm:$0xff]   ;;  %v496_v33 = vld [vmem:[%s661_s0 + $0xe0] ss:$16 sps:$4 sm:$0xff]   ;;  %v497_v34 = vld [vmem:[%s661_s0 + $0xe8] ss:$16 sps:$4 sm:$0xff]  }
   0xc   :  { %277 = vmatprep.subr.bf16.mxu0 %v468_v13  ;;  %320 = vmatprep.subr.bf16.mxu1 %v470_v14  ;;  %v363_v32 = vld [vmem:[%s663_s2] sm:$0xff]  ;;  %v500_v36 = vld [vmem:[%s661_s0 + $0x10c] ss:$16 sps:$4 sm:$0xff]   ;;  %v503_v41 = vld [vmem:[%s661_s0 + $0x108] ss:$16 sps:$4 sm:$0xff]  }
   0xd   :  { %436 = vmatprep.mubr.msk.bf16.mxu0 %vm254_vm0, %v510_v31  ;;  %438 = vmatprep.mubr.msk.bf16.mxu1 %vm254_vm0, %v510_v31  ;;  %v498_v35 = vld [vmem:[%s661_s0 + $0x104] ss:$16 sps:$4 sm:$0xff]   ;;  %v54_v38 = vld [vmem:[%s661_s0 + $0x128] sm:$0x77]  ;;  %v502_v40 = vld [vmem:[%s661_s0 + $0x100] ss:$16 sps:$4 sm:$0xff]  }
   0xe   :  { %v53_v37 = vld [vmem:[%s661_s0 + $0x120] sm:$0x77]  ;;  %367 = vperm.xlu0 %449, %v363_v32   ;;  %v364_v39 = vld [vmem:[%s663_s2 + $0x8] sm:$0xff]  ;;  %v434_v43 = vcombine.high %v54_v38, %v54_v38  ;;  %v433_v45 = vcombine.low %v54_v38, %v54_v38 }
   0xf   :  { %278 = vmatpush1.bf16.msra.mxu0 %v472_v15  ;;  %321 = vmatpush1.bf16.msra.mxu1 %v473_v16  ;;  %v432_v42 = vcombine.high %v53_v37, %v53_v37  ;;  %v431_v44 = vcombine.low %v53_v37, %v53_v37  ;;  %v508_v48 = vld [vmem:[%s662_s1] ss:$8 sps:$4 sm:$0xff]  }
  0x10   :  { %279 = vmatprep.subr.bf16.mxu0 %v474_v17  ;;  %322 = vmatprep.subr.bf16.mxu1 %v476_v18  ;;  %v266_v47 = vsel %vm258_vm1, %v433_v45, 0 }
  0x11   :  { %v260_v46 = vsel %vm258_vm1, %v431_v44, 0 }
  0x12   :  { %372 = vperm.xlu0 %449, %v364_v39  }
  0x13   :  { %280 = vmatpush1.bf16.msra.mxu0 %v478_v19  ;;  %323 = vmatpush1.bf16.msra.mxu1 %v479_v20 }
  0x14   :  { %281 = vmatprep.subr.bf16.mxu0 %v480_v21  ;;  %324 = vmatprep.subr.bf16.mxu1 %v482_v22 }
  0x17   :  { %282 = vmatpush1.bf16.msra.mxu0 %v484_v23  ;;  %325 = vmatpush1.bf16.msra.mxu1 %v485_v24 }
  0x18   :  { %283 = vmatprep.subr.bf16.mxu0 %v486_v25  ;;  %326 = vmatprep.subr.bf16.mxu1 %v488_v26 }
  0x1b   :  { %284 = vmatpush1.bf16.msra.mxu0 %v490_v27  ;;  %327 = vmatpush1.bf16.msra.mxu1 %v491_v28 }
  0x1c   :  { %285 = vmatprep.subr.bf16.mxu0 %v492_v29  ;;  %328 = vmatprep.subr.bf16.mxu1 %v494_v30 }
  0x1f   :  { %286 = vmatpush1.bf16.msra.mxu0 %v496_v33  ;;  %329 = vmatpush1.bf16.msra.mxu1 %v497_v34 }
  0x20   :  { %287 = vmatprep.subr.bf16.mxu0 %v498_v35  ;;  %330 = vmatprep.subr.bf16.mxu1 %v500_v36 }
  0x23   :  { %288 = vmatpush1.bf16.msra.mxu0 %v502_v40  ;;  %331 = vmatpush1.bf16.msra.mxu1 %v503_v41 }
  0x24   :  { %435 = vmatprep.subr.msk.bf16.mxu0 %vm258_vm1, %v432_v42  ;;  %437 = vmatprep.subr.msk.bf16.mxu1 %vm258_vm1, %v434_v43 }
  0x27   :  { %290 = vmatpush1.bf16.msra.mxu0 %v260_v46  ;;  %333 = vmatpush1.bf16.msra.mxu1 %v266_v47 }
  0x2a   :  { %304 = vmatmul.mubr.bf16.vlgmr.msra.gmra.mrb[0].mxu0 %v508_v48  ;;  %347 = vmatmul.mubr.bf16.vlgmr.msra.gmra.mrb[0].mxu1 %v508_v48 }
  0x8d   :  { %v368_v49 = vpop.permute.xlu0 %367 }
  0x91   :  { %v373_v1 = vpop.permute.xlu0 %372 }
  0xfd   :  { %v305_v50 = vpop.f32.mrb[0].mxu0  ;;  %v348_v51 = vpop.f32.mrb[0].mxu1 }
  0xfe   :  { %v307_v52 = vpop.f32.mrb[1].mxu0  ;;  %v350_v53 = vpop.f32.mrb[1].mxu1 }
  0xff   :  { %v357_v54 = vmax.f32 %v305_v50, %v307_v52  ;;  %v359_v55 = vmax.f32 %v348_v51, %v350_v53  ;;  %v309_v56 = vpop.f32.mrb[2].mxu0  ;;  %v352_v57 = vpop.f32.mrb[2].mxu1 }
 0x100   :  { %v311_v58 = vpop.f32.mrb[3].mxu0  ;;  %v354_v59 = vpop.f32.mrb[3].mxu1 }
 0x101   :  { %v361_v60 = vmax.f32 %v357_v54, %v359_v55  ;;  %v358_v61 = vmax.f32 %v309_v56, %v311_v58  ;;  %v360_v62 = vmax.f32 %v352_v57, %v354_v59 }
 0x103   :  { %v375_v63 = vadd.f32 %v368_v49, %v361_v60  ;;  %v362_v0 = vmax.f32 %v358_v61, %v360_v62 }
 0x105   :  { %v376_v2 = vadd.f32 %v373_v1, %v362_v0  ;;  %v377_v3 = vmax.f32 %v375_v63, 0.0 }
 0x107   :  { %v378_v4 = vmax.f32 %v376_v2, 0.0 }
 0x109   :  { %v446_v5 = vpack.c.bf16 %v378_v4, %v377_v3 }
 0x10b   :  { %447 = vst [vmem:[%s664_s3] sm:$0xff] %v446_v5  }

// kernel: net_forward.5
= control target key start
LH: loop header
LB: loop body
LE: loop exit
PB: predicated region body
PF: predicated region fallthrough
CT: control target
= control target key end

     0   :  { %v770_v1 = vmov 0   ;;  %v98_v20 = vlaneseq  ;;  %v771_v25 = vmov 1966171168   ;;  %vm264_vm0 = vcmask 130048   ;;  %s981_s0 = inlined_call_operand.vmem [shape: bf16[2,400], index: 0, kind: input, shape index: {}]   ;;  %s982_s1 = inlined_call_operand.vmem [shape: bf16[400,120], index: 1, kind: input, shape index: {}]   ;;  %s983_s2 = inlined_call_operand.vmem [shape: f32[1,120], index: 2, kind: input, shape index: {}]   ;;  %s984_s3 = inlined_call_operand.vmem [shape: bf16[120,84], index: 3, kind: input, shape index: {}]   ;;  %s985_s4 = inlined_call_operand.vmem [shape: f32[1,84], index: 4, kind: input, shape index: {}]   ;;  %s986_s5 = inlined_call_operand.vmem [shape: bf16[84,10], index: 5, kind: input, shape index: {}]   ;;  %s987_s6 = inlined_call_operand.vmem [shape: f32[1,10], index: 6, kind: input, shape index: {}]   ;;  %s988_s7 = inlined_call_operand.hbm [shape: f32[2,10], index: 7, kind: output, shape index: {}]  }
   0x1   :  { %v707_v0 = vld [vmem:[%s982_s1 + $0x40] sm:$0xff]   ;;  %308 = vmatprep.subr.bf16.mxu1 %v770_v1  ;;  %v710_v4 = vld [vmem:[%s982_s1 + $0x48] sm:$0xff]   ;;  %v713_v7 = vld [vmem:[%s982_s1 + $0x50] sm:$0xff]   ;;  %v96_v26 = vunpack.c.l.s4 %v771_v25  ;;  %v772_v38 = vmov 0.0  }
   0x2   :  { %v708_v2 = vld [vmem:[%s982_s1 + $0x80] sm:$0xff]   ;;  %628 = vmatprep.subr.bf16.mxu0 %v707_v0  ;;  %v711_v5 = vld [vmem:[%s982_s1 + $0x88] sm:$0xff]   ;;  %v714_v8 = vld [vmem:[%s982_s1 + $0x90] sm:$0xff]   ;;  %v99_v27 = vshrl.u32 %v98_v20, 7 }
   0x3   :  { %v709_v3 = vld [vmem:[%s982_s1] sm:$0xff]   ;;  %309 = vmatpush1.bf16.msra.mxu1 %v708_v2  ;;  %v712_v6 = vld [vmem:[%s982_s1 + $0x8] sm:$0xff]   ;;  %v715_v9 = vld [vmem:[%s982_s1 + $0x10] sm:$0xff]   ;;  %v97_v30 = vunpack.c.0.s8 %v96_v26 }
   0x4   :  { %629 = vmatpush3.bf16.msra.mxu0 %v709_v3  ;;  %310 = vmatprep.subr.bf16.mxu1 %v770_v1  ;;  %v716_v10 = vld [vmem:[%s982_s1 + $0x58] sm:$0xff]   ;;  %v719_v13 = vld [vmem:[%s982_s1 + $0x60] sm:$0xff]   ;;  %v722_v16 = vld [vmem:[%s982_s1 + $0x68] sm:$0xff]  }
   0x5   :  { %630 = vmatprep.subr.bf16.mxu0 %v710_v4  ;;  %v717_v11 = vld [vmem:[%s982_s1 + $0x98] sm:$0xff]   ;;  %v720_v14 = vld [vmem:[%s982_s1 + $0xa0] sm:$0xff]   ;;  %v723_v17 = vld [vmem:[%s982_s1 + $0xa8] sm:$0xff]   ;;  %v100_v32 = vsub.s32 %v97_v30, %v99_v27 }
   0x6   :  { %v718_v12 = vld [vmem:[%s982_s1 + $0x18] sm:$0xff]   ;;  %v721_v15 = vld [vmem:[%s982_s1 + $0x20] sm:$0xff]   ;;  %v724_v18 = vld [vmem:[%s982_s1 + $0x28] sm:$0xff]  }
   0x7   :  { %311 = vmatpush1.bf16.msra.mxu1 %v711_v5  ;;  %v725_v19 = vld [vmem:[%s982_s1 + $0x70] sm:$0xff]   ;;  %v583_v23 = vld.sshfl [vmem:[%s981_s0] sm:$0x33 pattern:$0x75316420]  ;;  %v728_v24 = vld [vmem:[%s982_s1 + $0x78] sm:$0xff]  }
   0x8   :  { %631 = vmatpush3.bf16.msra.mxu0 %v712_v6  ;;  %312 = vmatprep.subr.bf16.mxu1 %v770_v1  ;;  %v726_v21 = vld [vmem:[%s982_s1 + $0xb0] sm:$0xff]   ;;  %v729_v28 = vld [vmem:[%s982_s1 + $0xb8] sm:$0xff]   ;;  %v94_v29 = vcombine.high %v583_v23, %v583_v23  ;;  %v731_v33 = vld [vmem:[%s982_s1 + $0xc0] sm:$0xff]   ;;  %v101_v36 = vrot.slane %v583_v23, %v100_v32 }
   0x9   :  { %632 = vmatprep.subr.bf16.mxu0 %v713_v7  ;;  %v727_v22 = vld [vmem:[%s982_s1 + $0x30] sm:$0xff]   ;;  %v730_v31 = vld [vmem:[%s982_s1 + $0x38] sm:$0xff]   ;;  %v732_v34 = vld [vmem:[%s984_s3] sm:$0xff]  }
   0xa   :  { %v108_v35 = vrot.slane %v94_v29, %v100_v32  ;;  %v109_v39 = vcombine.high %v101_v36, %v101_v36  ;;  %v733_v40 = vld [vmem:[%s984_s3 + $0x8] sm:$0xff]  }
   0xb   :  { %313 = vmatpush1.bf16.msra.mxu1 %v714_v8 }
   0xc   :  { %633 = vmatpush3.bf16.msra.mxu0 %v715_v9  ;;  %314 = vmatprep.subr.bf16.mxu1 %v770_v1  ;;  %v110_v37 = vcombine.high %v108_v35, %v108_v35 }
   0xd   :  { %634 = vmatprep.subr.bf16.mxu0 %v716_v10  ;;  %300 = vmatprep.mubr.bf16.mxu0 %v108_v35 }
   0xe   :  { %609 = vmatprep.mubr.msk.bf16.mxu1 %vm264_vm0, %v110_v37 }
   0xf   :  { %315 = vmatpush1.bf16.msra.mxu1 %v717_v11 }
  0x10   :  { %635 = vmatpush3.bf16.msra.mxu0 %v718_v12  ;;  %316 = vmatprep.subr.bf16.mxu1 %v770_v1 }
  0x11   :  { %636 = vmatprep.subr.bf16.mxu0 %v719_v13 }
  0x13   :  { %317 = vmatpush1.bf16.msra.mxu1 %v720_v14 }
  0x14   :  { %637 = vmatpush3.bf16.msra.mxu0 %v721_v15  ;;  %318 = vmatprep.subr.bf16.mxu1 %v770_v1 }
  0x15   :  { %638 = vmatprep.subr.bf16.mxu0 %v722_v16 }
  0x17   :  { %319 = vmatpush1.bf16.msra.mxu1 %v723_v17 }
  0x18   :  { %639 = vmatpush3.bf16.msra.mxu0 %v724_v18  ;;  %320 = vmatprep.subr.bf16.mxu1 %v770_v1 }
  0x19   :  { %640 = vmatprep.subr.bf16.mxu0 %v725_v19 }
  0x1b   :  { %321 = vmatpush1.bf16.msra.mxu1 %v726_v21 }
  0x1c   :  { %641 = vmatpush3.bf16.msra.mxu0 %v727_v22  ;;  %322 = vmatprep.subr.bf16.mxu1 %v770_v1 }
  0x1d   :  { %642 = vmatprep.subr.bf16.mxu0 %v728_v24 }
  0x1f   :  { %323 = vmatpush1.bf16.msra.mxu1 %v729_v28 }
  0x20   :  { %643 = vmatpush3.bf16.msra.mxu0 %v730_v31  ;;  %324 = vmatprep.subr.bf16.mxu1 %v770_v1 }
  0x21   :  { %666 = vmatprep.subr.bf16.mxu0 %v772_v38 }
  0x23   :  { %301 = vmatmul.mubr.bf16.vlgmr.msra.gmra.mrb[0].mxu0 %v101_v36  ;;  %325 = vmatpush1.bf16.msra.mxu1 %v731_v33 }
  0x24   :  { %667 = vmatpush3.bf16.msra.mxu0 %v732_v34 }
  0x25   :  { %12 = vsyncpa [#allocation3], 0  ;;  %668 = vmatprep.subr.bf16.mxu0 %v772_v38  ;;  %686 = vmatprep.subr.bf16.mxu1 %v772_v38  ;;  %v734_v41 = vld [vmem:[%s984_s3 + $0x10] sm:$0xff]   ;;  %v735_v42 = vld [vmem:[%s984_s3 + $0x18] sm:$0xff]   ;;  %vm421_vm1 = vcmask 1043456   ;;  %vm773_vm2 = vmmov 0  }
  0x26   :  { %341 = vmatmul.mubr.bf16.vlgmr.msra.gmra.mrb[0].mxu1 %v109_v39  ;;  %v736_v43 = vld [vmem:[%s984_s3 + $0x20] sm:$0xff]   ;;  %v737_v44 = vld [vmem:[%s984_s3 + $0x28] sm:$0xff]   ;;  %v738_v45 = vld [vmem:[%s984_s3 + $0x30] sm:$0xff]   ;;  %682 = vmatprep.mubr.msk.bf16.mxu0 %vm773_vm2, %v772_v38  ;;  %vm417_vm3 = vcmask 982016   ;;  %vm522_vm4 = vcmask 1041408   ;;  %vm518_vm5 = vcmask 687104  }
  0x27   :  { %v739_v46 = vld [vmem:[%s984_s3 + $0x38] ss:$0 sps:$4 sm:$0xff]   ;;  %698 = vmatprep.mubr.msk.bf16.mxu1 %vm773_vm2, %v772_v38  ;;  %v740_v48 = vld [vmem:[%s986_s5] sm:$0xff]   ;;  %v741_v49 = vld [vmem:[%s986_s5 + $0x8] sm:$0xff]   ;;  %vm566_vm6 = vcmask 74752  }
  0x28   :  { %669 = vmatpush3.bf16.msra.mxu0 %v733_v40  ;;  %v423_v47 = vsel %vm421_vm1, %v739_v46, 0  ;;  %687 = vmatpush3.bf16.msra.mxu1 %v740_v48  ;;  %v742_v50 = vld [vmem:[%s986_s5 + $0x10] sm:$0xff]   ;;  %v743_v51 = vld [vmem:[%s986_s5 + $0x18] sm:$0xff]   ;;  %v582_v54 = vld [vmem:[%s983_s2] ss:$0 sm:$0xff] }
  0x29   :  { %670 = vmatprep.subr.bf16.mxu0 %v772_v38  ;;  %688 = vmatprep.subr.bf16.mxu1 %v772_v38  ;;  %v744_v2 = vld [vmem:[%s986_s5 + $0x20] sm:$0xff]   ;;  %v745_v3 = vld [vmem:[%s986_s5 + $0x28] ss:$0 sps:$4 sm:$0x33]   ;;  %s774_s5 = smov [#allocation2]  }
  0x2a   :  { %v524_v4 = vsel %vm522_vm4, %v745_v3, 0  ;;  %v610_v5 = vld [vmem:[%s985_s4] ss:$0 sm:$0xff]  ;;  %s574_s12 = sshll.u32 %s774_s5, 4  ;;  %s575_s12 = int_to_ptr.vmem [resolvable:$true] %s574_s12 }
  0x2b   :  { %v620_v13 = vld [vmem:[%s987_s6] ss:$0 sm:$0xff]  ;;  %s746_s4 = scalar_lea.vmem %s575_s12, 32  ;;  %p751_p1 = scmp.lt.s32.totalorder %s575_s12, %s575_s12 }
  0x2c   :  { %671 = vmatpush3.bf16.msra.mxu0 %v734_v41  ;;  %689 = vmatpush3.bf16.msra.mxu1 %v741_v49  ;;  %p747_p0 = scmp.ne.s32.totalorder %s575_s12, %s746_s4  ;;  %p752_p2 = scmp.lt.s32.totalorder %s746_s4, %s746_s4 }
  0x2d   :  { %672 = vmatprep.subr.bf16.mxu0 %v772_v38  ;;  %690 = vmatprep.subr.bf16.mxu1 %v772_v38 }
  0x2e   :  { %p753_p3 = por %p752_p2, %p751_p1 }
  0x30   :  { %673 = vmatpush3.bf16.msra.mxu0 %v735_v42  ;;  %691 = vmatpush3.bf16.msra.mxu1 %v742_v50  ;;  %p754_p4 = pnand %p753_p3, %p747_p0 }
  0x31   :  { %674 = vmatprep.subr.bf16.mxu0 %v772_v38  ;;  %692 = vmatprep.subr.bf16.mxu1 %v772_v38 }
  0x34   :  { %675 = vmatpush3.bf16.msra.mxu0 %v736_v43  ;;  %693 = vmatpush3.bf16.msra.mxu1 %v743_v51 }
  0x35   :  { %676 = vmatprep.subr.bf16.mxu0 %v772_v38  ;;  %694 = vmatprep.subr.bf16.mxu1 %v772_v38 }
  0x38   :  { %677 = vmatpush3.bf16.msra.mxu0 %v737_v44  ;;  %695 = vmatpush3.bf16.msra.mxu1 %v744_v2 }
  0x39   :  { %678 = vmatprep.subr.bf16.mxu0 %v772_v38  ;;  %696 = vmatprep.subr.bf16.mxu1 %v772_v38 }
  0x3c   :  { %679 = vmatpush3.bf16.msra.mxu0 %v738_v45  ;;  %697 = vmatpush3.bf16.msra.mxu1 %v524_v4 }
  0x3d   :  { %680 = vmatprep.subr.bf16.mxu0 %v772_v38 }
  0x40   :  { %681 = vmatpush3.bf16.msra.mxu0 %v423_v47 }
  0xf6   :  { %v644_v52 = vpop.f32.mrb[0].mxu0 }
  0xf7   :  { %v645_v53 = vpop.f32.mrb[1].mxu0 }
  0xf8   :  { %v646_v55 = vadd.f32 %v645_v53, %v644_v52  ;;  %v647_v56 = vpop.f32.mrb[2].mxu0 }
  0xf9   :  { %v648_v57 = vpop.f32.mrb[3].mxu0  ;;  %v342_v58 = vpop.f32.mrb[0].mxu1 }
  0xfa   :  { %v303_v59 = vadd.f32 %v646_v55, %v582_v54  ;;  %v344_v60 = vpop.f32.mrb[1].mxu1 }
  0xfb   :  { %v345_v61 = vpop.f32.mrb[2].mxu1 }
  0xfc   :  { %v343_v62 = vadd.f32 %v342_v58, %v303_v59  ;;  %v346_v63 = vpop.f32.mrb[3].mxu1 }
  0xfe   :  { %v348_v0 = vmax.f32 %v343_v62, 0.0 }
 0x100   :  { %v349_v1 = vpack.c.bf16 %v348_v0, %v348_v0 }
 0x102   :  { %683 = vmatmul.mubr.msk.bf16.vlgmr.msra.gmra.mrb[4].mxu0 %vm417_vm3, %v349_v1 }
 0x1d5   :  { %v459_v6 = vpop.f32.mrb[4].mxu0 }
 0x1d6   :  { %v460_v7 = vadd.f32 %v610_v5, %v459_v6  ;;  %v684_v8 = vpop.f32.mrb[5].mxu0 }
 0x1d7   :  { %v462_v9 = vpop.f32.mrb[6].mxu0 }
 0x1d8   :  { %v465_v10 = vmax.f32 %v460_v7, 0.0  ;;  %v685_v11 = vpop.f32.mrb[7].mxu0 }
 0x1da   :  { %v466_v12 = vpack.c.bf16 %v465_v10, %v465_v10 }
 0x1dc   :  { %699 = vmatmul.mubr.msk.bf16.vlgmr.msra.gmra.mrb[4].mxu1 %vm518_vm5, %v466_v12 }
 0x2af   :  { %v560_v14 = vpop.f32.mrb[4].mxu1 }
 0x2b0   :  { %v561_v15 = vadd.f32 %v620_v13, %v560_v14  ;;  %v700_v16 = vpop.f32.mrb[5].mxu1 }
 0x2b1   :  { %v563_v17 = vpop.f32.mrb[6].mxu1 }
 0x2b2   :  { %v701_v18 = vpop.f32.mrb[7].mxu1  ;;  %567 = vst.msk [vmem:[#allocation2] sm:$0x3] %vm566_vm6, %v561_v15 }
 0x2b3   :  { %757 = shalt.err (!%p754_p4)
}
 0x2b4   :  { %s758_s6 = scalar_lea.hbm %s988_s7, 32 }
 0x2b5   :  { %p759_p5 = scmp.ne.s32.totalorder %s988_s7, %s758_s6  ;;  %p762_p6 = scmp.lt.u32.totalorder %s758_s6, %s988_s7 }
 0x2b7   :  { %p764_p7 = pnand %p762_p6, %p759_p5 }
 0x2b9   :  { %767 = shalt.err (!%p764_p7)
}
 0x2ba   :  { %577 = dma.vmem_to_hbm [thread:$0]  %s575_s12, 32, %s988_s7, [#allocation3]  }
 0x2bb   :  { %768 = dma.done.wait [#allocation3], 32  }
 0x2bc   :  { %769 = vsyncadd [#allocation3], 4294967264 }
 0x2bd   :  { %581 = vsyncpa [#allocation3], 1 }

</bundles_post_ra>
